<compile_context>
chip_gen: v6e
topology: v6e:2x2x1
jax: 0.10.0
libtpu: 0.0.40
codegen_flags: <defaults>
</compile_context>

<pallas_src>
import functools
import math

import jax
import jax.numpy as jnp
from jax import lax
from jax.experimental import pallas as pl
from jax.experimental.pallas import tpu as pltpu


# Scoped VMEM budget: above the 16/32 MiB defaults, below v7x's 64 MiB physical VMEM
# (v5e/v6e have 128 MiB and could go larger, but this is generation-safe).
_VMEM_LIMIT_BYTES = 48 * 1024 * 1024


def _pick_tile(dim, pref):
    """Preferred tile if it divides the dim, else fall back to the full extent."""
    if dim <= pref or dim % pref != 0:
        return dim
    return pref


# ----------------------------- Tiled GEMM kernel -----------------------------

def _matmul_kernel(a_ref, b_ref, o_ref, acc_ref):
    @pl.when(pl.program_id(2) == 0)
    def _init():
        acc_ref[...] = jnp.zeros_like(acc_ref)

    # bf16 operands straight into the MXU, f32 accumulation.
    acc_ref[...] += jnp.dot(a_ref[...], b_ref[...],
                            preferred_element_type=jnp.float32)

    @pl.when(pl.program_id(2) == pl.num_programs(2) - 1)
    def _store():
        o_ref[...] = acc_ref[...].astype(o_ref.dtype)


def pallas_matmul(a, b, out_dtype=jnp.bfloat16, tm=256, tn=256, tk=512):
    """(M, K) @ (K, N) -> (M, N). Tiled + pipelined, bf16 MXU, f32 accumulator."""
    M, K = a.shape
    K2, N = b.shape
    assert K == K2
    tm = _pick_tile(M, tm)
    tn = _pick_tile(N, tn)   # keep tn a multiple of 128 at real sizes (v5e MXU geometry)
    tk = _pick_tile(K, tk)
    grid = (M // tm, N // tn, K // tk)
    return pl.pallas_call(
        _matmul_kernel,
        out_shape=jax.ShapeDtypeStruct((M, N), out_dtype),
        grid_spec=pltpu.PrefetchScalarGridSpec(
            num_scalar_prefetch=0,
            grid=grid,
            in_specs=[
                pl.BlockSpec((tm, tk), lambda i, j, k: (i, k)),
                pl.BlockSpec((tk, tn), lambda i, j, k: (k, j)),
            ],
            out_specs=pl.BlockSpec((tm, tn), lambda i, j, k: (i, j)),
            scratch_shapes=[pltpu.VMEM((tm, tn), jnp.float32)],
        ),
        compiler_params=pltpu.CompilerParams(
            dimension_semantics=("parallel", "parallel", "arbitrary"),
            vmem_limit_bytes=_VMEM_LIMIT_BYTES,
        ),
    )(a, b)


# ----------------------------- Attention kernel ------------------------------

def _attn_kernel(q_ref, k_ref, v_ref, cos_ref, sin_ref, o_ref, *,
                 scale, num_heads, head_dim):
    # Half-width rotary tables (HF duplicates cos/sin across the two halves).
    cos = cos_ref[0].astype(jnp.float32)     # (T, head_dim // 2)
    sin = sin_ref[0].astype(jnp.float32)
    d2 = head_dim // 2
    dn = (((1,), (1,)), ((), ()))            # contract last dims -> no k.T needed

    # All heads of one batch element per grid step; per-head slices of the
    # (T, hidden) block are 128-lane aligned (head_dim is a multiple of 128).
    for h in range(num_heads):
        sl = slice(h * head_dim, (h + 1) * head_dim)
        q = q_ref[0, :, sl].astype(jnp.float32)      # (T, hd) f32 elementwise math
        k = k_ref[0, :, sl].astype(jnp.float32)
        v = v_ref[0, :, sl]                          # (T, hd) bf16 for the MXU

        # HF RoPE: x*cos + rotate_half(x)*sin, written per half -> no DxD matmul,
        # no extra "rot" input, just two static half slices.
        q1, q2 = q[:, :d2], q[:, d2:]
        k1, k2 = k[:, :d2], k[:, d2:]
        q1r = q1 * cos - q2 * sin
        q2r = q2 * cos + q1 * sin
        k1r = k1 * cos - k2 * sin
        k2r = k2 * cos + k1 * sin

        # scores: q_rot . k_rot == q1r.k1r + q2r.k2r  (bf16 into the MXU, f32 acc).
        s = lax.dot_general(q1r.astype(jnp.bfloat16), k1r.astype(jnp.bfloat16),
                            dn, preferred_element_type=jnp.float32)
        s = s + lax.dot_general(q2r.astype(jnp.bfloat16), k2r.astype(jnp.bfloat16),
                                dn, preferred_element_type=jnp.float32)
        s = s * scale

        # F.scaled_dot_product_attention with attn_mask=None, non-causal.
        s = s - jnp.max(s, axis=-1, keepdims=True)
        p = jnp.exp(s)
        l = jnp.sum(p, axis=-1, keepdims=True)
        o = jnp.dot(p.astype(jnp.bfloat16), v, preferred_element_type=jnp.float32)
        o = o * pl.reciprocal(l, approx=True)

        # Fused down-cast, stored straight into the (B, T, hidden)-contiguous layout
        # consumed by o_proj (no glue-JAX transpose / cast pass).
        o_ref[0, :, sl] = o.astype(o_ref.dtype)


def pallas_attention(q, k, v, cos, sin, num_heads, head_dim):
    """q/k/v: (B, T, hidden) bf16; cos/sin: (B, T, head_dim//2). Returns (B, T, hidden) bf16."""
    B, T, H = q.shape
    d2 = cos.shape[-1]
    scale = 1.0 / math.sqrt(head_dim)
    kernel = functools.partial(_attn_kernel, scale=scale,
                               num_heads=num_heads, head_dim=head_dim)
    qkv_spec = pl.BlockSpec((1, T, H), lambda b: (b, 0, 0))
    cs_spec = pl.BlockSpec((1, T, d2), lambda b: (b, 0, 0))
    return pl.pallas_call(
        kernel,
        out_shape=jax.ShapeDtypeStruct((B, T, H), jnp.bfloat16),
        grid=(B,),
        in_specs=[qkv_spec, qkv_spec, qkv_spec, cs_spec, cs_spec],
        out_specs=pl.BlockSpec((1, T, H), lambda b: (b, 0, 0)),
        compiler_params=pltpu.CompilerParams(
            dimension_semantics=("parallel",),
            vmem_limit_bytes=_VMEM_LIMIT_BYTES,
        ),
    )(q, k, v, cos, sin)


# ---------------------------- Module equivalent ------------------------------

class QuantLlamaAttentionPallas:
    def __init__(self, hidden_size, num_heads, num_kv_heads, w_qkv, w_o,
                 max_new_tokens, base=10000.0):
        assert hidden_size % num_heads == 0
        self.hidden_size = hidden_size
        self.num_heads = num_heads
        self.num_kv_heads = num_kv_heads        # forward splits qkv equally -> == num_heads
        self.head_dim = hidden_size // num_heads
        assert self.head_dim % 2 == 0
        # Keep MXU operands in bf16 (weights converted once here, not per call).
        self.w_qkv = w_qkv.astype(jnp.bfloat16)     # (H, 3H), x @ W layout
        self.w_o = w_o.astype(jnp.bfloat16)         # (H, H)

        # Half-width rotary cache, HF LlamaRotaryEmbedding semantics.
        hd = self.head_dim
        inv_freq = 1.0 / (base ** (jnp.arange(0, hd, 2, dtype=jnp.float32) / hd))
        t = jnp.arange(max_new_tokens, dtype=jnp.float32)
        freqs = jnp.outer(t, inv_freq)              # (max, hd//2)
        self.cos_cache = jnp.cos(freqs)             # float32
        self.sin_cache = jnp.sin(freqs)

    def __call__(self, hidden_states, position_ids=None):
        B, T, H = hidden_states.shape
        nh, hd = self.num_heads, self.head_dim

        # qkv_proj (AWQ GEMM) -- tiled bf16 Pallas GEMM, bf16 output (fused cast).
        x = hidden_states.reshape(B * T, H).astype(jnp.bfloat16)
        qkv = pallas_matmul(x, self.w_qkv, out_dtype=jnp.bfloat16)
        qkv = qkv.reshape(B, T, 3, nh, hd)
        # Head-major (B, T, hidden) layout: no (B, nh, T, hd) transposes needed.
        q = qkv[:, :, 0].reshape(B, T, H)
        k = qkv[:, :, 1].reshape(B, T, H)
        v = qkv[:, :, 2].reshape(B, T, H)

        if position_ids is None:
            position_ids = jnp.broadcast_to(jnp.arange(T), (B, T))
        cos = self.cos_cache[position_ids]          # (B, T, hd//2)
        sin = self.sin_cache[position_ids]

        attn = pallas_attention(q, k, v, cos, sin, nh, hd)     # (B, T, H) bf16

        # o_proj (AWQ GEMM); module returns half precision.
        out = pallas_matmul(attn.reshape(B * T, H), self.w_o, out_dtype=jnp.bfloat16)
        out = out.reshape(B, T, H).astype(jnp.float16)
        return out, None, None


# -------------------------------- Reference ----------------------------------

def reference_forward(hidden_states, w_qkv, w_o, cos_h, sin_h,
                      num_heads, head_dim, position_ids):
    B, T, H = hidden_states.shape
    x32 = hidden_states.reshape(B * T, H).astype(jnp.float32)
    qkv = (x32 @ w_qkv.astype(jnp.float32)).astype(jnp.float16)
    qkv = qkv.reshape(B, T, 3, num_heads, head_dim)
    q = qkv[:, :, 0].transpose(0, 2, 1, 3).astype(jnp.float32)
    k = qkv[:, :, 1].transpose(0, 2, 1, 3).astype(jnp.float32)
    v = qkv[:, :, 2].transpose(0, 2, 1, 3).astype(jnp.float32)
    cos = jnp.concatenate([cos_h, cos_h], axis=-1)[position_ids][:, None]   # (B,1,T,hd)
    sin = jnp.concatenate([sin_h, sin_h], axis=-1)[position_ids][:, None]

    def rot_half(x):
        d2 = x.shape[-1] // 2
        return jnp.concatenate([-x[..., d2:], x[..., :d2]], axis=-1)

    qe = q * cos + rot_half(q) * sin
    ke = k * cos + rot_half(k) * sin
    s = jnp.einsum('bhqd,bhkd->bhqk', qe, ke) / math.sqrt(head_dim)
    p = jax.nn.softmax(s, axis=-1)
    o = jnp.einsum('bhqk,bhkd->bhqd', p, v)
    o = o.transpose(0, 2, 1, 3).reshape(B, T, H)
    out = o.reshape(B * T, H) @ w_o.astype(jnp.float32)
    return out.astype(jnp.float16).reshape(B, T, H)


# ---------------------------------- Main --------------------------------------

if __name__ == "__main__":
    B, T = 2, 8
    hidden_size, num_heads = 256, 2          # head_dim = 128 (Llama's native head dim)
    head_dim = hidden_size // num_heads
    max_new_tokens = 64

    key = jax.random.PRNGKey(0)
    k1, k2, k3 = jax.random.split(key, 3)
    hidden_states = (jax.random.normal(k1, (B, T, hidden_size), jnp.float32)
                     .astype(jnp.float16))
    w_qkv = (0.02 * jax.random.normal(k2, (hidden_size, 3 * hidden_size),
                                      jnp.float32)).astype(jnp.float16)
    w_o = (0.02 * jax.random.normal(k3, (hidden_size, hidden_size),
                                    jnp.float32)).astype(jnp.float16)

    attn = QuantLlamaAttentionPallas(hidden_size, num_heads, num_heads,
                                     w_qkv, w_o, max_new_tokens)

    out, _, _ = attn(hidden_states)
    out = jax.block_until_ready(out)
    assert out.shape == (B, T, hidden_size) and out.dtype == jnp.float16

    position_ids = jnp.broadcast_to(jnp.arange(T), (B, T))
    ref = reference_forward(hidden_states, w_qkv, w_o, attn.cos_cache,
                            attn.sin_cache, num_heads, head_dim, position_ids)
    err = jnp.max(jnp.abs(out.astype(jnp.float32) - ref.astype(jnp.float32)))
    assert jnp.allclose(out.astype(jnp.float32), ref.astype(jnp.float32),
                        rtol=5e-2, atol=5e-2), float(err)

    print("KERNEL_OK")
</pallas_src>

<mosaic_0001>
module attributes {stable_mosaic.version = 11 : i64} {
  func.func @_matmul_kernel(%arg0: i32, %arg1: i32, %arg2: i32, %arg3: memref<16x256xbf16, #tpu.memory_space<vmem>>, %arg4: memref<256x256xbf16, #tpu.memory_space<vmem>>, %arg5: memref<16x256xbf16, #tpu.memory_space<vmem>>, %arg6: memref<16x256xf32, #tpu.memory_space<vmem>>) attributes {dimension_semantics = [#tpu.dimension_semantics<parallel>, #tpu.dimension_semantics<parallel>, #tpu.dimension_semantics<arbitrary>], iteration_bounds = array<i64: 1, 3, 1>, scalar_prefetch = 0 : i64, scratch_operands = 1 : i64, tpu.core_type = #tpu.core_type<tc>, window_params = [{transform_indices = @transform_0, window_bounds = array<i64: 16, 256>}, {transform_indices = @transform_1, window_bounds = array<i64: 256, 256>}, {transform_indices = @transform_2, window_bounds = array<i64: 16, 256>}]} {
    %c0_i32 = arith.constant 0 : i32
    %0 = arith.cmpi eq, %arg2, %c0_i32 : i32
    %1 = arith.extui %0 : i1 to i32
    %c0_i32_0 = arith.constant 0 : i32
    %2 = arith.cmpi ne, %1, %c0_i32_0 : i32
    scf.if %2 {
      %cst_10 = arith.constant 0.000000e+00 : f32
      %12 = vector.broadcast %cst_10 : f32 to vector<16x256xf32>
      %c0_11 = arith.constant 0 : index
      %c0_12 = arith.constant 0 : index
      %13 = vector.load %arg6[%c0_11, %c0_12] : memref<16x256xf32, #tpu.memory_space<vmem>>, vector<16x256xf32>
      tpu.vector_store %arg6[%c0_11, %c0_12], %12 {strides = array<i32>} : memref<16x256xf32, #tpu.memory_space<vmem>>, vector<16x256xf32>,
    } else {
    }
    %c0 = arith.constant 0 : index
    %c0_1 = arith.constant 0 : index
    %3 = vector.load %arg6[%c0, %c0_1] : memref<16x256xf32, #tpu.memory_space<vmem>>, vector<16x256xf32>
    %c0_2 = arith.constant 0 : index
    %c0_3 = arith.constant 0 : index
    %4 = vector.load %arg3[%c0_2, %c0_3] : memref<16x256xbf16, #tpu.memory_space<vmem>>, vector<16x256xbf16>
    %c0_4 = arith.constant 0 : index
    %c0_5 = arith.constant 0 : index
    %5 = vector.load %arg4[%c0_4, %c0_5] : memref<256x256xbf16, #tpu.memory_space<vmem>>, vector<256x256xbf16>
    %cst = arith.constant dense<0.000000e+00> : vector<16x256xf32>
    %6 = tpu.matmul %4, %5, %cst {dimension_numbers = #tpu.dot_dimension_numbers<[1], [0], [0], [1], [0, 0, 1, 1], [], []>} : vector<16x256xbf16>, vector<256x256xbf16>, vector<16x256xf32> -> vector<16x256xf32>
    %7 = arith.addf %3, %6 : vector<16x256xf32>
    %c0_6 = arith.constant 0 : index
    %c0_7 = arith.constant 0 : index
    %8 = vector.load %arg6[%c0_6, %c0_7] : memref<16x256xf32, #tpu.memory_space<vmem>>, vector<16x256xf32>
    tpu.vector_store %arg6[%c0_6, %c0_7], %7 {strides = array<i32>} : memref<16x256xf32, #tpu.memory_space<vmem>>, vector<16x256xf32>,
    %c0_i32_8 = arith.constant 0 : i32
    %9 = arith.cmpi eq, %arg2, %c0_i32_8 : i32
    %10 = arith.extui %9 : i1 to i32
    %c0_i32_9 = arith.constant 0 : i32
    %11 = arith.cmpi ne, %10, %c0_i32_9 : i32
    scf.if %11 {
      %c0_10 = arith.constant 0 : index
      %c0_11 = arith.constant 0 : index
      %12 = vector.load %arg6[%c0_10, %c0_11] : memref<16x256xf32, #tpu.memory_space<vmem>>, vector<16x256xf32>
      %13 = arith.truncf %12 : vector<16x256xf32> to vector<16x256xbf16>
      %c0_12 = arith.constant 0 : index
      %c0_13 = arith.constant 0 : index
      %14 = vector.load %arg5[%c0_12, %c0_13] : memref<16x256xbf16, #tpu.memory_space<vmem>>, vector<16x256xbf16>
      tpu.vector_store %arg5[%c0_12, %c0_13], %13 {strides = array<i32>} : memref<16x256xbf16, #tpu.memory_space<vmem>>, vector<16x256xbf16>,
    } else {
    }
    return
  }
  func.func @transform_0(%arg0: i32, %arg1: i32, %arg2: i32) -> (i32, i32) {
    %c0_i32 = arith.constant 0 : i32
    return %arg0, %arg2 : i32, i32
  }
  func.func @transform_1(%arg0: i32, %arg1: i32, %arg2: i32) -> (i32, i32) {
    %c0_i32 = arith.constant 0 : i32
    return %arg2, %arg1 : i32, i32
  }
  func.func @transform_2(%arg0: i32, %arg1: i32, %arg2: i32) -> (i32, i32) {
    %c0_i32 = arith.constant 0 : i32
    return %arg0, %arg1 : i32, i32
  }
}

</mosaic_0001>

<bundles_post_ra>
// kernel: tpu_custom_call.1
= control target key start
LH: loop header
LB: loop body
LE: loop exit
PB: predicated region body
PF: predicated region fallthrough
CT: control target
= control target key end

     0   :  { %7 = vsyncpa [#allocation4], 0  ;;  %s1198_s0 = inlined_call_operand.hbm [shape: bf16[16,256], index: 0, kind: input, shape index: {}]   ;;  %s1199_s1 = inlined_call_operand.hbm [shape: bf16[256,768], index: 1, kind: input, shape index: {}]   ;;  %s1200_s2 = inlined_call_operand.hbm [shape: bf16[16,768], index: 2, kind: output, shape index: {}]  }
   0x1   :  { %8 = vsyncpa [#allocation7], 0 }
   0x2   :  { %10 = vsyncpa [#allocation7 + $0x1], 0 }
   0x3   :  { %11 = vsyncpa [#allocation5], 0 }
   0x4   :  { %13 = vsyncpa [#allocation5 + $0x1], 0  ;;  %s985_s9 = smov 0   ;;  %s987_s10 = smov 0  }
   0x5   :  { %s989_s11 = smov 0   ;;  %s991_s12 = smov 0  }
   0x6   :  { %s993_s13 = smov 0   ;;  %s995_s14 = smov 0  }
   0x7 LB: > { %s634_s15 = sadd.s32 4294967295, %s959_s14   ;;  %s635_s16 = sadd.s32 4294967294, %s959_s14   ;;  %s959_s14 = sphi %s995_s14, %s19_s14   ;;  %s955_s13 = sphi %s993_s13, %s1223_s13   ;;  %s951_s12 = sphi %s991_s12, %s1222_s12   ;;  %s947_s11 = sphi %s989_s11, %s1221_s11   ;;  %s943_s10 = sphi %s987_s10, %s1220_s10   ;;  %s939_s9 = sphi %s985_s9, %s1219_s9  }
   0x8   : > { %p82_p0 = scmp.ne.s32.totalorder %s947_s11, %s943_s10  ;;  %p83_p1 = scmp.eq.s32.totalorder %s959_s14, 0 }
   0x9   : > { %p88_p2 = scmp.ne.s32.totalorder %s943_s10, %s939_s9  ;;  %p1022_p3 = scmp.eq.s32.totalorder %s634_s15, 0 }
   0xa   : > { %p1026_p4 = por %p83_p1, %p82_p0  ;;  %p114_p5 = scmp.eq.s32.totalorder %s634_s15, 2 }
   0xb   : > { %p1032_p6 = por %p1022_p3, %p88_p2  ;;  %p120_p7 = scmp.eq.s32.totalorder %s635_s16, 2 }
   0xc   : > { %p1036_p8 = por %p114_p5, %p82_p0  ;;  %p636_p9 = scmp.ge.s32.totalorder %s959_s14, 1 }
   0xd   : > { %s1207_s19 = scalar_select %p1032_p6, 1, 0 }
   0xe   : > { %s1208_s20 = scalar_select %p1036_p8, 1, 0 }
   0xf   : > { %p1041_p10 = por %p120_p7, %p88_p2  ;;  %p127_p11 = scmp.lt.s32.totalorder %s959_s14, 4 }
  0x10   : > { %s961_s23 = smov [#allocation3]   ;;  %p712_p0 = scmp.lt.s32.totalorder %s959_s14, 3 }
  0x11   : > { %s1209_s21 = scalar_select %p1041_p10, 1, 0 }
  0x12   : > { %p1046_p12 = pnand %p636_p9, %p127_p11  ;;  %s145_s24 = sshll.u32 %s961_s23, 4  ;;  %s146_s24 = int_to_ptr.vmem [resolvable:$true] %s145_s24 }
  0x13   : > { %1210 = sst [smem:[#allocation12_spill]] %s1209_s21  ;;  %p1061_p2 = pnand %p712_p0, %p1026_p4 }
  0x14   : > { %p699_p13 = pneg %p1046_p12  ;;  %s34_s27 = sadd.s32 1, %s955_s13 }
  0x15   : > { %s832_s28 = scalar_lea.vmem %s146_s24, 256  ;;  %p840_p10 = scmp.lt.s32.totalorder %s146_s24, %s146_s24 }
  0x16   : > { %p1055_p1 = pnand %p699_p13, %p1022_p3  ;;  %p833_p7 = scmp.ne.s32.totalorder %s146_s24, %s832_s28 }
  0x17   : > { %p841_p8 = scmp.lt.s32.totalorder %s832_s28, %s832_s28 }
  0x18   : > { %p823_p5 = pneg %p1055_p1 }
  0x19   : > { %p842_p6 = por %p841_p8, %p840_p10 }
  0x1a   : > { %p835_p9 = pnand %p833_p7, %p823_p5 }
  0x1c   : > { %p836_p11 = pneg %p835_p9 }
  0x1e   : > { %p843_p13 = pnand %p842_p6, %p836_p11 }
  0x20   : > { %846 = shalt.err (!%p843_p13)
}
  0x21   : > { %s1204_s29 = smov 128   ;;  %s963_s30 = smov 8  }
  0x22   : > { %702 = dma.hbm_to_vmem [thread:$0]  (!%p1055_p1), %s1198_s0, 256, %s146_s24, [#allocation4], %s1204_s29, %s1204_s29, %s963_s30  }
  0x23   : > { %p36_p4 = scmp.ge.s32.totalorder %s34_s27, 3  ;;  %s75_s5 = sadd.s32 1, %s947_s11 }
  0x24   : > { %s159_s6 = sand.u32 1, %s947_s11   ;;  %s687_s15 = sshll.u32 %s955_s13, 7 }
  0x25   : > { %s1225_s27 = smov (%p36_p4, %s34_s27), 0  ;;  %s639_s7 = sshll.u32 %s159_s6, 8 }
  0x26   : > { %s71_s8 = ssub.s32 %s955_s13, %s1225_s27  ;;  %s172_s23 = scalar_lea.hbm %s1199_s1, %s687_s15 }
  0x27   : > { %p73_p6 = scmp.eq.s32.totalorder %s71_s8, 0  ;;  %s163_s25 = scalar_lea.vmem [#allocation6], %s639_s7 }
  0x28   : > { %s173_s28 = sshll.u32 %s163_s25, 4  ;;  %s160_s24 = scalar_lea.sflag [#allocation7], %s159_s6  ;;  %s174_s28 = int_to_ptr.vmem [resolvable:$true] %s173_s28 }
  0x29   : > { %s1087_s21 = scalar_select %p73_p6, %s947_s11, %s75_s5  }
  0x2a   : > { %p849_p8 = pneg %p1061_p2  ;;  %s860_s3 = scalar_lea.vmem %s174_s28, 4096 }
  0x2b   : > { %p861_p10 = scmp.ne.s32.totalorder %s174_s28, %s860_s3  ;;  %s964_s4 = smov [#allocation6]  }
  0x2c   : > { %s865_s29 = sshll.u32 %s964_s4, 4  ;;  %s866_s29 = int_to_ptr.vmem [resolvable:$false] %s865_s29 }
  0x2d   : > { %p863_p0 = pnand %p861_p10, %p849_p8  ;;  %s867_s8 = scalar_lea.vmem %s866_s29, 8192 }
  0x2e   : > { %p868_p5 = scmp.lt.s32.totalorder %s174_s28, %s866_s29  ;;  %p869_p7 = scmp.lt.s32.totalorder %s867_s8, %s860_s3 }
  0x2f   : > { %p864_p1 = pneg %p863_p0 }
  0x30   : > { %p870_p9 = por %p869_p7, %p868_p5 }
  0x32   : > { %p871_p11 = pnand %p870_p9, %p864_p1 }
  0x34   : > { %874 = shalt.err (!%p871_p11)
}
  0x35   : > { %s965_s7 = smov 384   ;;  %s1214_s5 = smov 128  }
  0x36   : > { %706 = dma.hbm_to_vmem [thread:$0]  (!%p1061_p2), %s172_s23, 4096, %s174_s28, %s160_s24, %s965_s7, %s1214_s5, %s963_s30  }
  0x37   : > { %185 = sbr.rel (%p1046_p12) target bundleno = 346 (0x15a), region = 28 }
  0x3c   : > { %926 = dma.done.wait (%p1022_p3), [#allocation4], 256  }
  0x3d   : > { %928 = vsyncadd (%p1022_p3), [#allocation4], 4294967040  ;;  %s1102_s29 = sand.u32 1, %s943_s10   ;;  %p1215_p2 = scmp.ne.s32.totalorder %s1207_s19, 0 }
  0x3e   : > { %s644_s6 = sshll.u32 %s1102_s29, 8  ;;  %s192_s26 = scalar_lea.sflag [#allocation7], %s1102_s29 }
  0x3f   : > { %s1106_s15 = scalar_lea.vmem [#allocation6], %s644_s6 }
  0x40   : > { %930 = dma.done.wait (%p1215_p2), %s192_s26, 4096  }
  0x41   : > { %932 = vsyncadd (%p1215_p2), %s192_s26, 4294963200  ;;  %v770_v0 = vld [vmem:[%s1106_s15 + $0x74] ss:$8 sps:$4 sm:$0xff]   ;;  %v772_v1 = vld [vmem:[%s1106_s15 + $0x70] ss:$8 sps:$4 sm:$0xff]   ;;  %s645_s17 = sshll.u32 %s1102_s29, 4 }
  0x42   : > { %438 = vmatprep.subr.bf16.mxu0 %v770_v0  ;;  %v773_v2 = vld [vmem:[%s1106_s15 + $0x64] ss:$8 sps:$4 sm:$0xff]   ;;  %v775_v3 = vld [vmem:[%s1106_s15 + $0x60] ss:$8 sps:$4 sm:$0xff]   ;;  %v776_v4 = vld [vmem:[%s1106_s15 + $0x54] ss:$8 sps:$4 sm:$0xff]  }
  0x43   : > { %439 = vmatpush1.bf16.msra.mxu0 %v772_v1  ;;  %v778_v5 = vld [vmem:[%s1106_s15 + $0x50] ss:$8 sps:$4 sm:$0xff]   ;;  %v779_v6 = vld [vmem:[%s1106_s15 + $0x44] ss:$8 sps:$4 sm:$0xff]   ;;  %v781_v7 = vld [vmem:[%s1106_s15 + $0x40] ss:$8 sps:$4 sm:$0xff]  }
  0x44   : > { %440 = vmatprep.subr.bf16.mxu0 %v773_v2  ;;  %v782_v8 = vld [vmem:[%s1106_s15 + $0x34] ss:$8 sps:$4 sm:$0xff]   ;;  %v784_v9 = vld [vmem:[%s1106_s15 + $0x30] ss:$8 sps:$4 sm:$0xff]   ;;  %v785_v10 = vld [vmem:[%s1106_s15 + $0x24] ss:$8 sps:$4 sm:$0xff]  }
  0x45   : > { %v787_v11 = vld [vmem:[%s1106_s15 + $0x20] ss:$8 sps:$4 sm:$0xff]   ;;  %v788_v12 = vld [vmem:[%s1106_s15 + $0x14] ss:$8 sps:$4 sm:$0xff]   ;;  %v790_v14 = vld [vmem:[%s1106_s15 + $0x10] ss:$8 sps:$4 sm:$0xff]  }
  0x46   : > { %v820_v13 = vld [vmem:[#allocation3 + $0x4] ss:$8 sps:$4 sm:$0xff]   ;;  %v791_v15 = vld [vmem:[%s1106_s15 + $0x4] ss:$8 sps:$4 sm:$0xff]   ;;  %v793_v16 = vld [vmem:[%s1106_s15] ss:$8 sps:$4 sm:$0xff]  }
  0x47   : > { %441 = vmatpush1.bf16.msra.mxu0 %v775_v3  ;;  %470 = vmatprep.mubr.bf16.mxu0 %v820_v13  ;;  %v794_v17 = vld [vmem:[%s1106_s15 + $0xf4] ss:$8 sps:$4 sm:$0xff]   ;;  %v796_v18 = vld [vmem:[%s1106_s15 + $0xf0] ss:$8 sps:$4 sm:$0xff]   ;;  %v797_v19 = vld [vmem:[%s1106_s15 + $0xe4] ss:$8 sps:$4 sm:$0xff]  }
  0x48   : > { %442 = vmatprep.subr.bf16.mxu0 %v776_v4  ;;  %v799_v20 = vld [vmem:[%s1106_s15 + $0xe0] ss:$8 sps:$4 sm:$0xff]   ;;  %v800_v21 = vld [vmem:[%s1106_s15 + $0xd4] ss:$8 sps:$4 sm:$0xff]   ;;  %v802_v22 = vld [vmem:[%s1106_s15 + $0xd0] ss:$8 sps:$4 sm:$0xff]  }
  0x49   : > { %v803_v23 = vld [vmem:[%s1106_s15 + $0xc4] ss:$8 sps:$4 sm:$0xff]   ;;  %v805_v24 = vld [vmem:[%s1106_s15 + $0xc0] ss:$8 sps:$4 sm:$0xff]   ;;  %v806_v25 = vld [vmem:[%s1106_s15 + $0xb4] ss:$8 sps:$4 sm:$0xff]  }
  0x4a   : > { %v808_v26 = vld [vmem:[%s1106_s15 + $0xb0] ss:$8 sps:$4 sm:$0xff]   ;;  %v809_v27 = vld [vmem:[%s1106_s15 + $0xa4] ss:$8 sps:$4 sm:$0xff]   ;;  %v811_v28 = vld [vmem:[%s1106_s15 + $0xa0] ss:$8 sps:$4 sm:$0xff]  }
  0x4b   : > { %443 = vmatpush1.bf16.msra.mxu0 %v778_v5  ;;  %v812_v29 = vld [vmem:[%s1106_s15 + $0x94] ss:$8 sps:$4 sm:$0xff]   ;;  %v814_v30 = vld [vmem:[%s1106_s15 + $0x90] ss:$8 sps:$4 sm:$0xff]   ;;  %v815_v31 = vld [vmem:[%s1106_s15 + $0x84] ss:$8 sps:$4 sm:$0xff]  }
  0x4c   : > { %444 = vmatprep.subr.bf16.mxu0 %v779_v6  ;;  %v817_v32 = vld [vmem:[%s1106_s15 + $0x80] ss:$8 sps:$4 sm:$0xff]   ;;  %v818_v33 = vld [vmem:[#allocation3] ss:$8 sps:$4 sm:$0xff]   ;;  %s215_s19 = scalar_lea.vmem [#allocation8], %s645_s17  ;;  %s690_s30 = sshll.u32 %s951_s12, 7 }
  0x4d   : > { %s527_s22 = sshll.u32 %s215_s19, 4  ;;  %s1151_s23 = scalar_lea.hbm %s1200_s2, %s690_s30  ;;  %s1146_s22 = int_to_ptr.vmem [resolvable:$true] %s527_s22 }
  0x4e   : > { %s511_s25 = scalar_lea.sflag [#allocation5], %s1102_s29  ;;  %s875_s28 = scalar_lea.vmem %s1146_s22, 256 }
  0x4f   : > { %445 = vmatpush1.bf16.msra.mxu0 %v781_v7  ;;  %p876_p3 = scmp.ne.s32.totalorder %s1146_s22, %s875_s28  ;;  %p1216_p12 = scmp.ne.s32.totalorder %s1208_s20, 0 }
  0x50   : > { %446 = vmatprep.subr.bf16.mxu0 %v782_v8  ;;  %s966_s12 = smov [#allocation8]  }
  0x51   : > { %p877_p13 = pnand %p876_p3, %p1216_p12  ;;  %s879_s24 = sshll.u32 %s966_s12, 4  ;;  %s880_s24 = int_to_ptr.vmem [resolvable:$false] %s879_s24 }
  0x52   : > { %s881_s3 = scalar_lea.vmem %s880_s24, 512  ;;  %p882_p6 = scmp.lt.s32.totalorder %s1146_s22, %s880_s24 }
  0x53   : > { %447 = vmatpush1.bf16.msra.mxu0 %v784_v9  ;;  %p878_p4 = pneg %p877_p13  ;;  %p883_p8 = scmp.lt.s32.totalorder %s881_s3, %s875_s28 }
  0x54   : > { %448 = vmatprep.subr.bf16.mxu0 %v785_v10 }
  0x55   : > { %p884_p10 = por %p883_p8, %p882_p6 }
  0x57   : > { %449 = vmatpush1.bf16.msra.mxu0 %v787_v11  ;;  %p885_p0 = pnand %p884_p10, %p878_p4 }
  0x58   : > { %450 = vmatprep.subr.bf16.mxu0 %v788_v12 }
  0x5b   : > { %451 = vmatpush1.bf16.msra.mxu0 %v790_v14 }
  0x5c   : > { %452 = vmatprep.subr.bf16.mxu0 %v791_v15 }
  0x5f   : > { %453 = vmatpush1.bf16.msra.mxu0 %v793_v16 }
  0x60   : > { %454 = vmatprep.subr.bf16.mxu0 %v794_v17 }
  0x63   : > { %455 = vmatpush2.bf16.msra.mxu0 %v796_v18 }
  0x64   : > { %456 = vmatprep.subr.bf16.mxu0 %v797_v19 }
  0x67   : > { %457 = vmatpush2.bf16.msra.mxu0 %v799_v20 }
  0x68   : > { %458 = vmatprep.subr.bf16.mxu0 %v800_v21 }
  0x6b   : > { %459 = vmatpush2.bf16.msra.mxu0 %v802_v22 }
  0x6c   : > { %460 = vmatprep.subr.bf16.mxu0 %v803_v23 }
  0x6f   : > { %461 = vmatpush2.bf16.msra.mxu0 %v805_v24 }
  0x70   : > { %462 = vmatprep.subr.bf16.mxu0 %v806_v25 }
  0x73   : > { %463 = vmatpush2.bf16.msra.mxu0 %v808_v26 }
  0x74   : > { %464 = vmatprep.subr.bf16.mxu0 %v809_v27 }
  0x77   : > { %465 = vmatpush2.bf16.msra.mxu0 %v811_v28 }
  0x78   : > { %466 = vmatprep.subr.bf16.mxu0 %v812_v29 }
  0x7b   : > { %467 = vmatpush2.bf16.msra.mxu0 %v814_v30 }
  0x7c   : > { %468 = vmatprep.subr.bf16.mxu0 %v815_v31 }
  0x7f   : > { %469 = vmatpush2.bf16.msra.mxu0 %v817_v32 }
  0x82   : > { %471 = vmatmul.mubr.bf16.vlgmr.msra.gmra.mxu0 %v818_v33 }
 0x142   : > { %v472_v34 = vpop.f32.mrf.mxu0 }
 0x144   : > { %v474_v35 = vpop.f32.mrf.mxu0 }
 0x145   : > { %v688_v36 = vpack.c.bf16 %v474_v35, %v472_v34 }
 0x146   : > { %v476_v37 = vpop.f32.mrf.mxu0 }
 0x147   : > { %508 = vst [vmem:[%s215_s19] sm:$0xff] %v688_v36 }
 0x148   : > { %v478_v38 = vpop.f32.mrf.mxu0 }
 0x149   : > { %v689_v39 = vpack.c.bf16 %v478_v38, %v476_v37 }
 0x14b   : > { %509 = vst [vmem:[%s215_s19 + $0x8] sm:$0xff] %v689_v39 }
 0x14c   : > { %888 = shalt.err (!%p885_p0)
}
 0x14d   : > { %s889_s4 = scalar_lea.hbm %s1151_s23, 256  ;;  %s893_s5 = scalar_lea.hbm %s1200_s2, 768 }
 0x14e   : > { %p890_p1 = scmp.ne.s32.totalorder %s1151_s23, %s889_s4  ;;  %p894_p9 = scmp.lt.s32.totalorder %s1151_s23, %s1200_s2 }
 0x14f   : > { %p895_p11 = scmp.lt.s32.totalorder %s893_s5, %s889_s4 }
 0x150   : > { %p891_p5 = pnand %p890_p1, %p1216_p12 }
 0x151   : > { %p896_p2 = por %p895_p11, %p894_p9 }
 0x152   : > { %p892_p7 = pneg %p891_p5 }
 0x154   : > { %p897_p3 = pnand %p896_p2, %p892_p7 }
 0x156   : > { %900 = shalt.err (!%p897_p3)
}
 0x157   : > { %s967_s15 = smov 128   ;;  %s968_s17 = smov 384  }
 0x158   : > { %s969_s19 = smov 8  }
 0x159   : > { %697 = dma.vmem_to_hbm [thread:$0]  (%p1216_p12), %s1146_s22, 256, %s1151_s23, %s511_s25, %s967_s15, %s968_s17, %s969_s19  }
 0x15a PF: > { %s1217_s30 = sld [smem:[#allocation12_spill]]  ;;  %p714_p13 = scmp.ge.s32.totalorder %s959_s14, 2 }
 0x15b   : > { %s542_s16 = sand.u32 1, %s939_s9  }
 0x15c   : > { %s543_s18 = scalar_lea.sflag [#allocation5], %s542_s16 }
 0x160   : > { %p1218_p4 = scmp.ne.s32.totalorder %s1217_s30, 0 }
 0x162   : > { %p708_p6 = pnand %p714_p13, %p1218_p4 }
 0x164   : > { %p709_p8 = pneg %p708_p6 }
 0x166   : > { %934 = dma.done.wait (%p709_p8), %s543_s18, 256  }
 0x167   : > { %936 = vsyncadd (%p709_p8), %s543_s18, 4294967040  ;;  %s19_s14 = sadd.s32 1, %s959_s14   ;;  %s1219_s9 = smov %s943_s10 }
 0x168   : > { %p16_p10 = scmp.ge.s32.totalorder %s19_s14, 5   ;;  %s1220_s10 = smov %s947_s11 }
 0x169   : > { %s1221_s11 = smov %s1087_s21  ;;  %s1222_s12 = smov %s955_s13 }
 0x16a   : > { %s1223_s13 = smov %s1225_s27  ;;  %18 = sbr.rel (!%p16_p10) target bundleno = 7 (0x7), region = 87 }
 0x16f   :  { %548 = vsyncpa [#allocation4], 1 }
 0x170   :  { %550 = vsyncpa [#allocation4 + $0x1], 1 }
 0x171   :  { %551 = vsyncpa [#allocation7], 1 }
 0x172   :  { %553 = vsyncpa [#allocation7 + $0x1], 1 }
 0x173   :  { %554 = vsyncpa [#allocation5], 1 }
 0x174   :  { %556 = vsyncpa [#allocation5 + $0x1], 1 }

</bundles_post_ra>
